<compile_context>
chip_gen: v5e
topology: v5e:2x2
jax: 0.10.0
libtpu: 0.0.40
codegen_flags: <defaults>
</compile_context>

<pallas_src>
import jax
import jax.numpy as jnp
from jax.experimental import pallas as pl
from jax.experimental.pallas import tpu as pltpu


# ----------------------------- kernel body ---------------------------------


def _cross_attn_kernel(x_ref, t_ref, wv_ref, bv_ref, o_ref):
    t = t_ref[...]
    w = wv_ref[...]
    if t.dtype != w.dtype:
        # Promote the narrower matmul operand (trace-time branch; dtypes static).
        ct = jnp.promote_types(t.dtype, w.dtype)
        t, w = t.astype(ct), w.astype(ct)
    # value projection: MXU matmul with f32 accumulation
    v = jnp.dot(t, w, preferred_element_type=jnp.float32) + bv_ref[...]
    # softmax over a size-1 key axis is identically 1.0 => attended == v,
    # so out = v + x (q/k path is provably dead code).
    o_ref[...] = (v + x_ref[...].astype(jnp.float32)).astype(o_ref.dtype)


# --------------------------- tiling / planning ------------------------------


def _round_up(x, m):
    return ((x + m - 1) // m) * m


def _round_down(x, m):
    return (x // m) * m


def _cdiv(a, b):
    return -(-a // b)


def _vmem_budget_bytes():
    """Per-generation VMEM budget: 75% of physical, fallback 64 MiB (v7x/TC)."""
    cap = 64 * 1024 * 1024
    try:
        info = pltpu.get_tpu_info()
        cap = int(getattr(info, "vmem_capacity_bytes", cap) or cap)
    except Exception:
        pass
    return (cap * 3) // 4


def _plan_tiling(B, D, H, x_sz, t_sz, w_sz, o_sz):
    """Pick (TB, TN, vmem_limit_bytes) from shapes, dtypes and the VMEM budget."""
    budget = _vmem_budget_bytes()
    # sublane packing of the narrowest tiled dtype: 8 rows f32, 16 bf16, 32 int8
    align = 8 * max(1, 4 // max(1, min(x_sz, t_sz, o_sz)))
    d_pad = _round_up(D, 128)
    h_pad = _round_up(H, 128)

    # -- hidden (lane) tile: keep the resident Wv^T slab under ~half the budget.
    if H <= 128 or 2 * d_pad * h_pad * w_sz <= budget // 2:
        tn = H                                    # single full-extent weight block
    else:
        tn = _round_down(min(max(128, (budget // 2) // (2 * d_pad * w_sz)), H), 128)
    tn_pad = _round_up(tn, 128)
    weight_bytes = 2 * (d_pad * tn_pad * w_sz + tn_pad * 4)   # Wv^T (+ bv), 2x buffered

    # -- batch tile from the remaining budget (2x double-buffered x, t, out tiles)
    per_row_bytes = 2 * (tn_pad * x_sz + d_pad * t_sz + tn_pad * o_sz)
    if B <= 2 * align:
        tb = B                                    # tiny batch: one full-extent block
    else:
        avail = max(budget - weight_bytes, align * per_row_bytes)
        tb = min(avail // per_row_bytes, 1024, B)
        if B >= 4 * align:                        # >=4 steps so DMA overlaps compute
            tb = min(tb, _round_up(_cdiv(B, 4), align))
        tb = max(align, _round_down(tb, align))
        if tb >= 256:                             # feed full MXU rows when possible
            tb = _round_down(tb, 128)
        steps = _cdiv(B, tb)
        if steps > 1 and steps % 2:               # even step count keeps both v7x TCs busy
            tb = max(align, _round_up(_cdiv(B, steps + 1), align))

    required = weight_bytes + _round_up(tb, align) * per_row_bytes
    vmem_limit = int(min(budget, max(32 << 20, required + (4 << 20))))
    return int(tb), int(tn), vmem_limit


# --------------------------- public wrapper ---------------------------------


def prepare_params(params, compute_dtype=None):
    """One-time layout/dtype prep (do NOT call per forward pass).

    Only Wv / bv are kept: softmax over a size-1 key axis is exactly 1.0, so the
    q/k projections never affect the output.  Wv is transposed to (D, H) so the
    kernel does a plain  t @ Wv  with no per-call transpose.  `compute_dtype`
    (e.g. jnp.bfloat16) casts the weight once to halve HBM/VMEM traffic; the
    bias stays f32 for the f32 accumulate.
    """
    wv = jnp.asarray(params["wv"])            # (H, D), PyTorch Linear layout
    H, _ = wv.shape
    wv_t = wv.T                                # (D, H)
    if compute_dtype is not None:
        wv_t = wv_t.astype(compute_dtype)
    bv = jnp.asarray(params["bv"], jnp.float32).reshape(1, H)
    return {"wv_t": wv_t, "bv": bv}


@jax.jit
def data_cross_attention(text_image_features, time_features, prepared):
    """prepared: output of prepare_params()."""
    x, t = text_image_features, time_features
    B, D = x.shape
    assert t.shape == (B, D)
    Dw, H = prepared["wv_t"].shape
    assert Dw == D
    assert D == H, "residual add requires input_dim == hidden_dim (as in PyTorch)"
    out_dtype = x.dtype

    TB, TN, vmem_limit = _plan_tiling(
        B, D, H,
        x.dtype.itemsize, t.dtype.itemsize,
        prepared["wv_t"].dtype.itemsize, jnp.dtype(out_dtype).itemsize)
    grid = (_cdiv(B, TB), _cdiv(H, TN))

    return pl.pallas_call(
        _cross_attn_kernel,
        out_shape=jax.ShapeDtypeStruct((B, H), out_dtype),
        grid=grid,
        in_specs=[
            pl.BlockSpec((TB, TN), lambda i, j: (i, j)),   # x residual tile
            pl.BlockSpec((TB, D), lambda i, j: (i, 0)),    # t activations (full D)
            pl.BlockSpec((D, TN), lambda i, j: (0, j)),    # Wv^T column slab
            pl.BlockSpec((1, TN), lambda i, j: (0, j)),    # bv slab
        ],
        out_specs=pl.BlockSpec((TB, TN), lambda i, j: (i, j)),
        compiler_params=pltpu.CompilerParams(
            dimension_semantics=("parallel", "parallel"),
            vmem_limit_bytes=vmem_limit,
        ),
    )(x, t, prepared["wv_t"], prepared["bv"])


# ------------------------------ reference -----------------------------------


def _reference_full_path(x, t, params):
    """Faithful pure-JAX replica of the PyTorch forward (including the dead
    q/k/softmax path), at highest matmul precision."""
    hi = jax.lax.Precision.HIGHEST
    q = jnp.dot(x, params["wq"].T, precision=hi) + params["bq"]
    k = jnp.dot(t, params["wk"].T, precision=hi) + params["bk"]
    v = jnp.dot(t, params["wv"].T, precision=hi) + params["bv"]
    scores = jnp.sum(q * k, axis=-1, keepdims=True) / jnp.sqrt(
        jnp.float32(k.shape[-1]))
    weights = jax.nn.softmax(scores, axis=-1)   # size-1 axis -> exactly 1.0
    return weights * v + x


def _make_params(key, input_dim, hidden_dim):
    ks = jax.random.split(key, 6)
    s = 1.0 / jnp.sqrt(jnp.float32(input_dim))
    return {
        "wq": jax.random.uniform(ks[0], (hidden_dim, input_dim), jnp.float32, -s, s),
        "bq": jax.random.uniform(ks[1], (hidden_dim,), jnp.float32, -s, s),
        "wk": jax.random.uniform(ks[2], (hidden_dim, input_dim), jnp.float32, -s, s),
        "bk": jax.random.uniform(ks[3], (hidden_dim,), jnp.float32, -s, s),
        "wv": jax.random.uniform(ks[4], (hidden_dim, input_dim), jnp.float32, -s, s),
        "bv": jax.random.uniform(ks[5], (hidden_dim,), jnp.float32, -s, s),
    }


if __name__ == "__main__":
    key = jax.random.PRNGKey(0)

    # ---- small shape (matches the module's intended usage) ----
    B, D = 8, 32
    kx, kt, kp = jax.random.split(key, 3)
    x = jax.random.normal(kx, (B, D), jnp.float32)
    t = jax.random.normal(kt, (B, D), jnp.float32)
    params = _make_params(kp, D, D)

    prepared = prepare_params(params)                      # f32 path
    out = jax.block_until_ready(data_cross_attention(x, t, prepared))
    ref = _reference_full_path(x, t, params)
    assert out.shape == (B, D)
    assert jnp.allclose(out, ref, atol=1e-4, rtol=1e-4), "f32 mismatch vs reference"

    # ---- bf16 fast path (halved HBM traffic; looser tolerance) ----
    prepared_bf = prepare_params(params, compute_dtype=jnp.bfloat16)
    out_bf = jax.block_until_ready(
        data_cross_attention(x.astype(jnp.bfloat16), t.astype(jnp.bfloat16),
                             prepared_bf))
    assert jnp.allclose(out_bf.astype(jnp.float32), ref, atol=0.1, rtol=0.1), \
        "bf16 mismatch vs reference"

    # ---- medium shape: exercises a multi-step (pipelined) batch grid ----
    B2, D2 = 64, 128
    k2x, k2t, k2p = jax.random.split(jax.random.PRNGKey(1), 3)
    x2 = jax.random.normal(k2x, (B2, D2), jnp.float32)
    t2 = jax.random.normal(k2t, (B2, D2), jnp.float32)
    params2 = _make_params(k2p, D2, D2)
    out2 = jax.block_until_ready(
        data_cross_attention(x2, t2, prepare_params(params2)))
    ref2 = _reference_full_path(x2, t2, params2)
    assert jnp.allclose(out2, ref2, atol=1e-4, rtol=1e-4), "multi-tile mismatch"

    print("KERNEL_OK")
</pallas_src>

<mosaic_0001>
module attributes {stable_mosaic.version = 11 : i64} {
  func.func @_cross_attn_kernel(%arg0: i32, %arg1: i32, %arg2: memref<8x32xf32, #tpu.memory_space<vmem>>, %arg3: memref<8x32xf32, #tpu.memory_space<vmem>>, %arg4: memref<32x32xf32, #tpu.memory_space<vmem>>, %arg5: memref<1x32xf32, #tpu.memory_space<vmem>>, %arg6: memref<8x32xf32, #tpu.memory_space<vmem>>) attributes {dimension_semantics = [#tpu.dimension_semantics<parallel>, #tpu.dimension_semantics<parallel>], iteration_bounds = array<i64: 1, 1>, scalar_prefetch = 0 : i64, scratch_operands = 0 : i64, tpu.core_type = #tpu.core_type<tc>, window_params = [{transform_indices = @transform_0, window_bounds = array<i64: 8, 32>}, {transform_indices = @transform_1, window_bounds = array<i64: 8, 32>}, {transform_indices = @transform_2, window_bounds = array<i64: 32, 32>}, {transform_indices = @transform_3, window_bounds = array<i64: 1, 32>}, {transform_indices = @transform_4, window_bounds = array<i64: 8, 32>}]} {
    %c0 = arith.constant 0 : index
    %c0_0 = arith.constant 0 : index
    %0 = vector.load %arg3[%c0, %c0_0] : memref<8x32xf32, #tpu.memory_space<vmem>>, vector<8x32xf32>
    %c0_1 = arith.constant 0 : index
    %c0_2 = arith.constant 0 : index
    %1 = vector.load %arg4[%c0_1, %c0_2] : memref<32x32xf32, #tpu.memory_space<vmem>>, vector<32x32xf32>
    %cst = arith.constant dense<0.000000e+00> : vector<8x32xf32>
    %2 = tpu.matmul %0, %1, %cst {dimension_numbers = #tpu.dot_dimension_numbers<[1], [0], [0], [1], [0, 0, 1, 1], [], []>} : vector<8x32xf32>, vector<32x32xf32>, vector<8x32xf32> -> vector<8x32xf32>
    %c0_3 = arith.constant 0 : index
    %c0_4 = arith.constant 0 : index
    %3 = vector.load %arg5[%c0_3, %c0_4] : memref<1x32xf32, #tpu.memory_space<vmem>>, vector<1x32xf32>
    %4 = vector.broadcast %3 : vector<1x32xf32> to vector<8x32xf32>
    %5 = arith.addf %2, %4 : vector<8x32xf32>
    %c0_5 = arith.constant 0 : index
    %c0_6 = arith.constant 0 : index
    %6 = vector.load %arg2[%c0_5, %c0_6] : memref<8x32xf32, #tpu.memory_space<vmem>>, vector<8x32xf32>
    %7 = arith.addf %5, %6 : vector<8x32xf32>
    %c0_7 = arith.constant 0 : index
    %c0_8 = arith.constant 0 : index
    %8 = vector.load %arg6[%c0_7, %c0_8] : memref<8x32xf32, #tpu.memory_space<vmem>>, vector<8x32xf32>
    tpu.vector_store %arg6[%c0_7, %c0_8], %7 {strides = array<i32>} : memref<8x32xf32, #tpu.memory_space<vmem>>, vector<8x32xf32>,
    return
  }
  func.func @transform_0(%arg0: i32, %arg1: i32) -> (i32, i32) {
    %c0_i32 = arith.constant 0 : i32
    return %arg0, %arg1 : i32, i32
  }
  func.func @transform_1(%arg0: i32, %arg1: i32) -> (i32, i32) {
    %c0_i32 = arith.constant 0 : i32
    %c0_i32_0 = arith.constant 0 : i32
    return %arg0, %c0_i32 : i32, i32
  }
  func.func @transform_2(%arg0: i32, %arg1: i32) -> (i32, i32) {
    %c0_i32 = arith.constant 0 : i32
    %c0_i32_0 = arith.constant 0 : i32
    return %c0_i32, %arg1 : i32, i32
  }
  func.func @transform_3(%arg0: i32, %arg1: i32) -> (i32, i32) {
    %c0_i32 = arith.constant 0 : i32
    %c0_i32_0 = arith.constant 0 : i32
    return %c0_i32, %arg1 : i32, i32
  }
  func.func @transform_4(%arg0: i32, %arg1: i32) -> (i32, i32) {
    %c0_i32 = arith.constant 0 : i32
    return %arg0, %arg1 : i32, i32
  }
}

</mosaic_0001>

<bundles_post_ra>
// kernel: data_cross_attention.1
= control target key start
LH: loop header
LB: loop body
LE: loop exit
PB: predicated region body
PF: predicated region fallthrough
CT: control target
= control target key end

     0   :  { %9 = vsyncpa [#allocation3], 0  ;;  %s271_s0 = inlined_call_operand.hbm [shape: f32[8,32], index: 0, kind: input, shape index: {}]   ;;  %s272_s1 = inlined_call_operand.hbm [shape: f32[8,32], index: 1, kind: input, shape index: {}]   ;;  %s273_s2 = inlined_call_operand.hbm [shape: f32[32,32], index: 2, kind: input, shape index: {}]   ;;  %s274_s3 = inlined_call_operand.vmem [shape: f32[1,32], index: 3, kind: input, shape index: {}]   ;;  %s275_s4 = inlined_call_operand.hbm [shape: f32[8,32], index: 4, kind: output, shape index: {}]  }
   0x1   :  { %10 = vsyncpa [#allocation6], 0  ;;  %s28_s17 = sshll.u32 %s272_s1, 4  ;;  %s29_s17 = int_to_ptr.hbm [resolvable:$true] %s28_s17 }
   0x2   :  { %11 = vsyncpa [#allocation4], 0  ;;  %s225_s18 = smov [#allocation5]   ;;  %s17_s22 = sshll.u32 %s271_s0, 4  ;;  %s18_s22 = int_to_ptr.hbm [resolvable:$true] %s17_s22 }
   0x3   :  { %s30_s19 = sshll.u32 %s225_s18, 4  ;;  %s226_s23 = smov [#allocation2]   ;;  %s31_s19 = int_to_ptr.vmem [resolvable:$true] %s30_s19 }
   0x4   :  { %33 = dma.hbm_to_vmem [thread:$0]  %s29_s17, 128, %s31_s19, [#allocation6]  }
   0x5   :  { %s19_s24 = sshll.u32 %s226_s23, 4  ;;  %s38_s27 = sshll.u32 %s273_s2, 4  ;;  %s20_s24 = int_to_ptr.vmem [resolvable:$true] %s19_s24  ;;  %s39_s27 = int_to_ptr.hbm [resolvable:$true] %s38_s27 }
   0x6   :  { %22 = dma.hbm_to_vmem [thread:$0]  %s18_s22, 128, %s20_s24, [#allocation3]  }
   0x7   :  { %s227_s1 = smov [#allocation7]   ;;  %s228_s29 = smov 128  }
   0x8   :  { %s40_s28 = sshll.u32 %s227_s1, 4  ;;  %s229_s30 = smov 8   ;;  %s41_s28 = int_to_ptr.vmem [resolvable:$true] %s40_s28 }
   0x9   :  { %46 = dma.hbm_to_vmem [thread:$0]  %s39_s27, 512, %s41_s28, [#allocation6], %s228_s29, %s228_s29, %s229_s30  }
   0xa   :  { %219 = dma.done.wait [#allocation3], 128  }
   0xb   :  { %220 = vsyncadd [#allocation3], 4294967168 }
   0xc   :  { %221 = dma.done.wait [#allocation6], 640  }
   0xd   :  { %222 = vsyncadd [#allocation6], 4294966656  ;;  %v65_v0 = vld [vmem:[#allocation7 + $0x18] sm:$0xff]  ;;  %v64_v1 = vld [vmem:[#allocation7 + $0x10] sm:$0xff]  ;;  %vm70_vm0 = vcmask 261120   ;;  %s230_s5 = smov [#allocation8]  }
   0xe   :  { %86 = vmatpush.msra.mxu0 %v65_v0  ;;  %v63_v2 = vld [vmem:[#allocation7 + $0x8] sm:$0xff]  ;;  %v62_v3 = vld [vmem:[#allocation7] sm:$0xff]  ;;  %v61_v4 = vld [vmem:[#allocation5] sm:$0xff]  ;;  %s102_s6 = sshll.u32 %s230_s5, 4  ;;  %s104_s9 = sshll.u32 %s275_s4, 4  ;;  %s103_s6 = int_to_ptr.vmem [resolvable:$true] %s102_s6  ;;  %s105_s9 = int_to_ptr.hbm [resolvable:$true] %s104_s9 }
   0xf   :  { %v122_v5 = vld [vmem:[%s274_s3] ss:$0 sm:$0xff] }
  0x10   :  { %87 = vmatpush.msra.mxu0 %v64_v1  ;;  %v94_v7 = vld [vmem:[#allocation2] sm:$0xff] }
  0x12   :  { %88 = vmatpush.msra.mxu0 %v63_v2 }
  0x14   :  { %89 = vmatpush.msra.mxu0 %v62_v3 }
  0x15   :  { %115 = vmatmul.msk.f32.vlgmr.msra.gmra.mxu0 %vm70_vm0, %v61_v4 }
  0x92   :  { %v91_v6 = vpop.f32.mrf.mxu0 }
  0x93   :  { %v92_v8 = vadd.f32 %v122_v5, %v91_v6 }
  0x95   :  { %v95_v9 = vadd.f32 %v94_v7, %v92_v8 }
  0x97   :  { %96 = vst.msk [vmem:[#allocation8] sm:$0xff] %vm70_vm0, %v95_v9 }
  0x98   :  { %107 = dma.vmem_to_hbm [thread:$0]  %s103_s6, 128, %s105_s9, [#allocation4]  }
  0x99   :  { %223 = dma.done.wait [#allocation4], 128  }
  0x9a   :  { %224 = vsyncadd [#allocation4], 4294967168 }
  0x9b   :  { %112 = vsyncpa [#allocation3], 1 }
  0x9c   :  { %113 = vsyncpa [#allocation6], 1 }
  0x9d   :  { %114 = vsyncpa [#allocation4], 1 }

</bundles_post_ra>
